<compile_context>
chip_gen: v6e
topology: v6e:2x2x1
jax: 0.10.0
libtpu: 0.0.40
codegen_flags: <defaults>
</compile_context>

<pallas_src>
import functools

import jax
import jax.numpy as jnp
from jax.experimental import pallas as pl
from jax.experimental.pallas import tpu as pltpu

LANE = 128         # lane width — feature dims padded to a multiple of this
SUBLANE_F32 = 8    # sublane multiple for f32 batch tiles
TB_CAP = 512       # max batch-tile rows (sweepable; 512 ~ HBM-roofline regime)


def _round_up(n: int, m: int) -> int:
    return ((n + m - 1) // m) * m


# ----------------------------------------------------------------------------
# Kernel: one batch tile of  relu( relu(x @ W1 + b1) @ W2 + b2 )
# x arrives f32 and is cast to bf16 on the VPU; matmuls run on the MXU with
# f32 accumulation; bias-add + ReLU stay in f32.
# ----------------------------------------------------------------------------
def _mlp_kernel(x_ref, w1_ref, b1_ref, w2_ref, b2_ref, o_ref):
    x = x_ref[...].astype(w1_ref.dtype)                      # (TB, Kp) f32->bf16
    h = jnp.dot(x, w1_ref[...], preferred_element_type=jnp.float32)
    h = jnp.maximum(h + b1_ref[...], 0.0)                    # (TB, Hp) f32
    y = jnp.dot(h.astype(w2_ref.dtype), w2_ref[...],
                preferred_element_type=jnp.float32)
    o_ref[...] = jnp.maximum(y + b2_ref[...], 0.0).astype(o_ref.dtype)


# ----------------------------------------------------------------------------
# One-time parameter preparation (transpose + lane padding + bf16 cast).
# PyTorch nn.Linear stores weight as (out, in); we store (in_pad, out_pad).
# Zero padding is exact: padded input cols are zero, padded hidden neurons get
# zero weights & bias (relu(0)=0 -> contribute nothing), padded output cols
# are sliced off after the kernel.
# ----------------------------------------------------------------------------
def prepare_params(w1, b1, w2, b2, *, param_dtype=jnp.bfloat16):
    in_size, hidden, out_size = w1.shape[1], w1.shape[0], w2.shape[0]
    kp, hp, np_ = (_round_up(d, LANE) for d in (in_size, hidden, out_size))

    w1_t = jnp.zeros((kp, hp), param_dtype).at[:in_size, :hidden].set(
        w1.T.astype(param_dtype))
    b1_p = jnp.zeros((1, hp), jnp.float32).at[0, :hidden].set(
        b1.astype(jnp.float32))
    w2_t = jnp.zeros((hp, np_), param_dtype).at[:hidden, :out_size].set(
        w2.T.astype(param_dtype))
    b2_p = jnp.zeros((1, np_), jnp.float32).at[0, :out_size].set(
        b2.astype(jnp.float32))
    return w1_t, b1_p, w2_t, b2_p


# ----------------------------------------------------------------------------
# Jitted forward implementation.
# ----------------------------------------------------------------------------
@functools.partial(jax.jit, static_argnames=("out_size", "single_buffer"))
def _forward_impl(x, w1_t, b1_p, w2_t, b2_p, *, out_size, single_buffer):
    B, K = x.shape
    Kp, Hp = w1_t.shape
    Np = w2_t.shape[1]

    # Batch tiling: large tiles amortize per-grid-step overhead; always emit at
    # least 2 parallel steps so both v7x TensorCores can be fed.
    num_tiles = max(2, pl.cdiv(B, TB_CAP))
    TB = min(TB_CAP, _round_up(pl.cdiv(B, num_tiles), SUBLANE_F32))
    B_pad = num_tiles * TB

    # Only materialize a padded copy of x when actually required; keep it f32
    # (the kernel casts to bf16 on the VPU) to avoid an extra HBM pass.
    if (B_pad, Kp) != (B, K):
        x_in = jnp.pad(x, ((0, B_pad - B), (0, Kp - K)))
    else:
        x_in = x

    def _const_spec(shape):
        # Grid-invariant operand: single-buffer it (index_map is constant).
        if single_buffer:
            return pl.BlockSpec(shape, lambda i: (0, 0),
                                pipeline_mode=pl.Buffered(1))
        return pl.BlockSpec(shape, lambda i: (0, 0))

    # VMEM budget: actual working set with 2x headroom, capped well under the
    # v7x 64 MiB physical ceiling.
    nbuf_w = 1 if single_buffer else 2
    vmem_need = (
        2 * TB * Kp * 4                            # x tile (f32, double-buffered)
        + nbuf_w * (Kp * Hp + Hp * Np) * 2         # weights (bf16)
        + nbuf_w * (Hp + Np) * 4                   # biases (f32)
        + 2 * TB * Np * 4                          # output tile (f32, double-buffered)
        + TB * (Kp + Hp) * 2 + TB * (Hp + Np) * 4  # in-kernel temporaries
    )
    vmem_limit = int(min(48 << 20, max(8 << 20, 2 * vmem_need)))

    cost = pl.CostEstimate(
        flops=2 * B_pad * (Kp * Hp + Hp * Np),
        transcendentals=0,
        bytes_accessed=(B_pad * Kp * 4 + (Kp * Hp + Hp * Np) * 2
                        + (Hp + Np) * 4 + B_pad * Np * 4),
    )

    y_pad = pl.pallas_call(
        _mlp_kernel,
        # f32 output matches the PyTorch reference; switch to bf16 here if the
        # consumer accepts it (halves writeback bytes, store stays lane-dense).
        out_shape=jax.ShapeDtypeStruct((B_pad, Np), jnp.float32),
        grid=(num_tiles,),
        in_specs=[
            pl.BlockSpec((TB, Kp), lambda i: (i, 0)),   # x tile: walks the batch
            _const_spec((Kp, Hp)),                      # W1: VMEM-resident
            _const_spec((1, Hp)),                       # b1
            _const_spec((Hp, Np)),                      # W2
            _const_spec((1, Np)),                       # b2
        ],
        out_specs=pl.BlockSpec((TB, Np), lambda i: (i, 0)),
        compiler_params=pltpu.CompilerParams(
            dimension_semantics=("parallel",),
            vmem_limit_bytes=vmem_limit,
        ),
        cost_estimate=cost,
    )(x_in, w1_t, b1_p, w2_t, b2_p)

    # Strip batch / lane padding.
    return y_pad[:B, :out_size]


def one_layer_net_forward(x, w1_t, b1_p, w2_t, b2_p, *, out_size):
    try:
        return _forward_impl(x, w1_t, b1_p, w2_t, b2_p,
                             out_size=out_size, single_buffer=True)
    except Exception:
        # pl.Buffered(1) / pipeline_mode not supported by this jax build:
        # fall back to default double-buffering (identical math).
        return _forward_impl(x, w1_t, b1_p, w2_t, b2_p,
                             out_size=out_size, single_buffer=False)


# ----------------------------------------------------------------------------
# Deterministic init mimicking torch.nn.Linear's uniform(-1/sqrt(in), 1/sqrt(in))
# ----------------------------------------------------------------------------
def _init_linear(key, out_features, in_features):
    kw, kb = jax.random.split(key)
    bound = 1.0 / jnp.sqrt(jnp.float32(in_features))
    w = jax.random.uniform(kw, (out_features, in_features), jnp.float32, -bound, bound)
    b = jax.random.uniform(kb, (out_features,), jnp.float32, -bound, bound)
    return w, b


if __name__ == "__main__":
    batch, input_size, hidden_neurons, output_size = 8, 16, 32, 4

    key = jax.random.PRNGKey(0)
    kx, k1, k2 = jax.random.split(key, 3)

    x = jax.random.normal(kx, (batch, input_size), jnp.float32)
    w1, b1 = _init_linear(k1, hidden_neurons, input_size)
    w2, b2 = _init_linear(k2, output_size, hidden_neurons)

    # One-time param prep (transpose + pad + bf16 cast), outside the hot path.
    w1_t, b1_p, w2_t, b2_p = prepare_params(w1, b1, w2, b2)

    y = one_layer_net_forward(x, w1_t, b1_p, w2_t, b2_p, out_size=output_size)
    y = jax.block_until_ready(y)

    # Reference in plain JAX f32 (same math as the PyTorch forward).
    ref = jnp.maximum(jnp.maximum(x @ w1.T + b1, 0.0) @ w2.T + b2, 0.0)
    assert y.shape == (batch, output_size)
    # bf16 MXU inputs shift results by ~1e-3..1e-2 vs f32; accumulate in f32.
    assert jnp.allclose(y, ref, atol=5e-2, rtol=5e-2), (
        float(jnp.max(jnp.abs(y - ref))))

    print("KERNEL_OK")
</pallas_src>

<mosaic_0001>
module attributes {stable_mosaic.version = 11 : i64} {
  func.func @_mlp_kernel(%arg0: i32, %arg1: memref<8x128xf32, #tpu.memory_space<vmem>>, %arg2: memref<128x128xbf16, #tpu.memory_space<vmem>>, %arg3: memref<1x128xf32, #tpu.memory_space<vmem>>, %arg4: memref<128x128xbf16, #tpu.memory_space<vmem>>, %arg5: memref<1x128xf32, #tpu.memory_space<vmem>>, %arg6: memref<8x128xf32, #tpu.memory_space<vmem>>) attributes {dimension_semantics = [#tpu.dimension_semantics<parallel>], iteration_bounds = array<i64: 2>, scalar_prefetch = 0 : i64, scratch_operands = 0 : i64, tpu.core_type = #tpu.core_type<tc>, window_params = [{transform_indices = @transform_0, window_bounds = array<i64: 8, 128>}, {pipeline_mode = #tpu.pipeline_mode<synchronous>, transform_indices = @transform_1, window_bounds = array<i64: 128, 128>}, {pipeline_mode = #tpu.pipeline_mode<synchronous>, transform_indices = @transform_2, window_bounds = array<i64: 1, 128>}, {pipeline_mode = #tpu.pipeline_mode<synchronous>, transform_indices = @transform_3, window_bounds = array<i64: 128, 128>}, {pipeline_mode = #tpu.pipeline_mode<synchronous>, transform_indices = @transform_4, window_bounds = array<i64: 1, 128>}, {transform_indices = @transform_5, window_bounds = array<i64: 8, 128>}]} {
    %c0 = arith.constant 0 : index
    %c0_0 = arith.constant 0 : index
    %0 = vector.load %arg1[%c0, %c0_0] : memref<8x128xf32, #tpu.memory_space<vmem>>, vector<8x128xf32>
    %1 = arith.truncf %0 : vector<8x128xf32> to vector<8x128xbf16>
    %c0_1 = arith.constant 0 : index
    %c0_2 = arith.constant 0 : index
    %2 = vector.load %arg2[%c0_1, %c0_2] : memref<128x128xbf16, #tpu.memory_space<vmem>>, vector<128x128xbf16>
    %cst = arith.constant dense<0.000000e+00> : vector<8x128xf32>
    %3 = tpu.matmul %1, %2, %cst {dimension_numbers = #tpu.dot_dimension_numbers<[1], [0], [0], [1], [0, 0, 1, 1], [], []>} : vector<8x128xbf16>, vector<128x128xbf16>, vector<8x128xf32> -> vector<8x128xf32>
    %c0_3 = arith.constant 0 : index
    %c0_4 = arith.constant 0 : index
    %4 = vector.load %arg3[%c0_3, %c0_4] : memref<1x128xf32, #tpu.memory_space<vmem>>, vector<1x128xf32>
    %5 = vector.broadcast %4 : vector<1x128xf32> to vector<8x128xf32>
    %6 = arith.addf %3, %5 : vector<8x128xf32>
    %cst_5 = arith.constant 0.000000e+00 : f32
    %7 = vector.broadcast %cst_5 : f32 to vector<8x128xf32>
    %8 = arith.maximumf %6, %7 : vector<8x128xf32>
    %9 = arith.truncf %8 : vector<8x128xf32> to vector<8x128xbf16>
    %c0_6 = arith.constant 0 : index
    %c0_7 = arith.constant 0 : index
    %10 = vector.load %arg4[%c0_6, %c0_7] : memref<128x128xbf16, #tpu.memory_space<vmem>>, vector<128x128xbf16>
    %cst_8 = arith.constant dense<0.000000e+00> : vector<8x128xf32>
    %11 = tpu.matmul %9, %10, %cst_8 {dimension_numbers = #tpu.dot_dimension_numbers<[1], [0], [0], [1], [0, 0, 1, 1], [], []>} : vector<8x128xbf16>, vector<128x128xbf16>, vector<8x128xf32> -> vector<8x128xf32>
    %c0_9 = arith.constant 0 : index
    %c0_10 = arith.constant 0 : index
    %12 = vector.load %arg5[%c0_9, %c0_10] : memref<1x128xf32, #tpu.memory_space<vmem>>, vector<1x128xf32>
    %13 = vector.broadcast %12 : vector<1x128xf32> to vector<8x128xf32>
    %14 = arith.addf %11, %13 : vector<8x128xf32>
    %cst_11 = arith.constant 0.000000e+00 : f32
    %15 = vector.broadcast %cst_11 : f32 to vector<8x128xf32>
    %16 = arith.maximumf %14, %15 : vector<8x128xf32>
    %c0_12 = arith.constant 0 : index
    %c0_13 = arith.constant 0 : index
    %17 = vector.load %arg6[%c0_12, %c0_13] : memref<8x128xf32, #tpu.memory_space<vmem>>, vector<8x128xf32>
    tpu.vector_store %arg6[%c0_12, %c0_13], %16 {strides = array<i32>} : memref<8x128xf32, #tpu.memory_space<vmem>>, vector<8x128xf32>,
    return
  }
  func.func @transform_0(%arg0: i32) -> (i32, i32) {
    %c0_i32 = arith.constant 0 : i32
    %c0_i32_0 = arith.constant 0 : i32
    return %arg0, %c0_i32 : i32, i32
  }
  func.func @transform_1(%arg0: i32) -> (i32, i32) {
    %c0_i32 = arith.constant 0 : i32
    %c0_i32_0 = arith.constant 0 : i32
    %c0_i32_1 = arith.constant 0 : i32
    return %c0_i32, %c0_i32_0 : i32, i32
  }
  func.func @transform_2(%arg0: i32) -> (i32, i32) {
    %c0_i32 = arith.constant 0 : i32
    %c0_i32_0 = arith.constant 0 : i32
    %c0_i32_1 = arith.constant 0 : i32
    return %c0_i32, %c0_i32_0 : i32, i32
  }
  func.func @transform_3(%arg0: i32) -> (i32, i32) {
    %c0_i32 = arith.constant 0 : i32
    %c0_i32_0 = arith.constant 0 : i32
    %c0_i32_1 = arith.constant 0 : i32
    return %c0_i32, %c0_i32_0 : i32, i32
  }
  func.func @transform_4(%arg0: i32) -> (i32, i32) {
    %c0_i32 = arith.constant 0 : i32
    %c0_i32_0 = arith.constant 0 : i32
    %c0_i32_1 = arith.constant 0 : i32
    return %c0_i32, %c0_i32_0 : i32, i32
  }
  func.func @transform_5(%arg0: i32) -> (i32, i32) {
    %c0_i32 = arith.constant 0 : i32
    %c0_i32_0 = arith.constant 0 : i32
    return %arg0, %c0_i32 : i32, i32
  }
}

module attributes {stable_mosaic.version = 11 : i64} {
  func.func @_mlp_kernel(%arg0: i32, %arg1: memref<8x128xf32, #tpu.memory_space<vmem>>, %arg2: memref<128x128xbf16, #tpu.memory_space<vmem>>, %arg3: memref<1x128xf32, #tpu.memory_space<vmem>>, %arg4: memref<128x128xbf16, #tpu.memory_space<vmem>>, %arg5: memref<1x128xf32, #tpu.memory_space<vmem>>, %arg6: memref<8x128xf32, #tpu.memory_space<vmem>>) attributes {dimension_semantics = [#tpu.dimension_semantics<parallel>], iteration_bounds = array<i64: 2>, scalar_prefetch = 0 : i64, scratch_operands = 0 : i64, tpu.core_type = #tpu.core_type<tc>, window_params = [{transform_indices = @transform_0, window_bounds = array<i64: 8, 128>}, {pipeline_mode = #tpu.pipeline_mode<synchronous>, transform_indices = @transform_1, window_bounds = array<i64: 128, 128>}, {pipeline_mode = #tpu.pipeline_mode<synchronous>, transform_indices = @transform_2, window_bounds = array<i64: 1, 128>}, {pipeline_mode = #tpu.pipeline_mode<synchronous>, transform_indices = @transform_3, window_bounds = array<i64: 128, 128>}, {pipeline_mode = #tpu.pipeline_mode<synchronous>, transform_indices = @transform_4, window_bounds = array<i64: 1, 128>}, {transform_indices = @transform_5, window_bounds = array<i64: 8, 128>}]} {
    %c0 = arith.constant 0 : index
    %c0_0 = arith.constant 0 : index
    %0 = vector.load %arg1[%c0, %c0_0] : memref<8x128xf32, #tpu.memory_space<vmem>>, vector<8x128xf32>
    %1 = arith.truncf %0 : vector<8x128xf32> to vector<8x128xbf16>
    %c0_1 = arith.constant 0 : index
    %c0_2 = arith.constant 0 : index
    %2 = vector.load %arg2[%c0_1, %c0_2] : memref<128x128xbf16, #tpu.memory_space<vmem>>, vector<128x128xbf16>
    %cst = arith.constant dense<0.000000e+00> : vector<8x128xf32>
    %3 = tpu.matmul %1, %2, %cst {dimension_numbers = #tpu.dot_dimension_numbers<[1], [0], [0], [1], [0, 0, 1, 1], [], []>} : vector<8x128xbf16>, vector<128x128xbf16>, vector<8x128xf32> -> vector<8x128xf32>
    %c0_3 = arith.constant 0 : index
    %c0_4 = arith.constant 0 : index
    %4 = vector.load %arg3[%c0_3, %c0_4] : memref<1x128xf32, #tpu.memory_space<vmem>>, vector<1x128xf32>
    %5 = vector.broadcast %4 : vector<1x128xf32> to vector<8x128xf32>
    %6 = arith.addf %3, %5 : vector<8x128xf32>
    %cst_5 = arith.constant 0.000000e+00 : f32
    %7 = vector.broadcast %cst_5 : f32 to vector<8x128xf32>
    %8 = arith.maximumf %6, %7 : vector<8x128xf32>
    %9 = arith.truncf %8 : vector<8x128xf32> to vector<8x128xbf16>
    %c0_6 = arith.constant 0 : index
    %c0_7 = arith.constant 0 : index
    %10 = vector.load %arg4[%c0_6, %c0_7] : memref<128x128xbf16, #tpu.memory_space<vmem>>, vector<128x128xbf16>
    %cst_8 = arith.constant dense<0.000000e+00> : vector<8x128xf32>
    %11 = tpu.matmul %9, %10, %cst_8 {dimension_numbers = #tpu.dot_dimension_numbers<[1], [0], [0], [1], [0, 0, 1, 1], [], []>} : vector<8x128xbf16>, vector<128x128xbf16>, vector<8x128xf32> -> vector<8x128xf32>
    %c0_9 = arith.constant 0 : index
    %c0_10 = arith.constant 0 : index
    %12 = vector.load %arg5[%c0_9, %c0_10] : memref<1x128xf32, #tpu.memory_space<vmem>>, vector<1x128xf32>
    %13 = vector.broadcast %12 : vector<1x128xf32> to vector<8x128xf32>
    %14 = arith.addf %11, %13 : vector<8x128xf32>
    %cst_11 = arith.constant 0.000000e+00 : f32
    %15 = vector.broadcast %cst_11 : f32 to vector<8x128xf32>
    %16 = arith.maximumf %14, %15 : vector<8x128xf32>
    %c0_12 = arith.constant 0 : index
    %c0_13 = arith.constant 0 : index
    %17 = vector.load %arg6[%c0_12, %c0_13] : memref<8x128xf32, #tpu.memory_space<vmem>>, vector<8x128xf32>
    tpu.vector_store %arg6[%c0_12, %c0_13], %16 {strides = array<i32>} : memref<8x128xf32, #tpu.memory_space<vmem>>, vector<8x128xf32>,
    return
  }
  func.func @transform_0(%arg0: i32) -> (i32, i32) {
    %c0_i32 = arith.constant 0 : i32
    %c0_i32_0 = arith.constant 0 : i32
    return %arg0, %c0_i32 : i32, i32
  }
  func.func @transform_1(%arg0: i32) -> (i32, i32) {
    %c0_i32 = arith.constant 0 : i32
    %c0_i32_0 = arith.constant 0 : i32
    %c0_i32_1 = arith.constant 0 : i32
    return %c0_i32, %c0_i32_0 : i32, i32
  }
  func.func @transform_2(%arg0: i32) -> (i32, i32) {
    %c0_i32 = arith.constant 0 : i32
    %c0_i32_0 = arith.constant 0 : i32
    %c0_i32_1 = arith.constant 0 : i32
    return %c0_i32, %c0_i32_0 : i32, i32
  }
  func.func @transform_3(%arg0: i32) -> (i32, i32) {
    %c0_i32 = arith.constant 0 : i32
    %c0_i32_0 = arith.constant 0 : i32
    %c0_i32_1 = arith.constant 0 : i32
    return %c0_i32, %c0_i32_0 : i32, i32
  }
  func.func @transform_4(%arg0: i32) -> (i32, i32) {
    %c0_i32 = arith.constant 0 : i32
    %c0_i32_0 = arith.constant 0 : i32
    %c0_i32_1 = arith.constant 0 : i32
    return %c0_i32, %c0_i32_0 : i32, i32
  }
  func.func @transform_5(%arg0: i32) -> (i32, i32) {
    %c0_i32 = arith.constant 0 : i32
    %c0_i32_0 = arith.constant 0 : i32
    return %arg0, %c0_i32 : i32, i32
  }
}

</mosaic_0001>

<bundles_post_ra>
// kernel: _forward_impl.1
= control target key start
LH: loop header
LB: loop body
LE: loop exit
PB: predicated region body
PF: predicated region fallthrough
CT: control target
= control target key end

     0   :  { %10 = vsyncpa [#allocation3], 0  ;;  %s871_s0 = inlined_call_operand.vmem [shape: f32[16,128], index: 0, kind: input, shape index: {}]   ;;  %s872_s1 = inlined_call_operand.hbm [shape: bf16[128,128], index: 1, kind: input, shape index: {}]   ;;  %s873_s2 = inlined_call_operand.vmem [shape: f32[1,128], index: 2, kind: input, shape index: {}]   ;;  %s874_s3 = inlined_call_operand.hbm [shape: bf16[128,128], index: 3, kind: input, shape index: {}]   ;;  %s875_s4 = inlined_call_operand.vmem [shape: f32[1,128], index: 4, kind: input, shape index: {}]   ;;  %s876_s5 = inlined_call_operand.vmem [shape: f32[16,128], index: 5, kind: output, shape index: {}]  }
   0x1   :  { %11 = vsyncpa [#allocation5], 0  ;;  %s796_s18 = smov 0  }
   0x2 LB: > { %s802_s19 = sadd.s32 4294967295, %s758_s18   ;;  %p556_p0 = scmp.ge.s32.totalorder %s758_s18, 1  ;;  %s758_s18 = sphi %s796_s18, %s17_s18  }
   0x3   : > { %p158_p1 = scmp.lt.s32.totalorder %s758_s18, 3  ;;  %s760_s20 = smov [#allocation2]  }
   0x4   : > { %s170_s21 = sshll.u32 %s760_s20, 4  ;;  %p658_p3 = scmp.eq.s32.totalorder %s802_s19, 0  ;;  %s171_s21 = int_to_ptr.vmem [resolvable:$true] %s170_s21 }
   0x5   : > { %p806_p2 = pnand %p556_p0, %p158_p1  ;;  %s761_s23 = smov [#allocation4]  }
   0x6   : > { %s186_s24 = sshll.u32 %s761_s23, 4  ;;  %s703_s26 = scalar_lea.vmem %s171_s21, 1024  ;;  %s187_s24 = int_to_ptr.vmem [resolvable:$true] %s186_s24 }
   0x7   : > { %p651_p4 = pneg %p806_p2  ;;  %p704_p7 = scmp.ne.s32.totalorder %s171_s21, %s703_s26 }
   0x8   : > { %p711_p10 = scmp.lt.s32.totalorder %s171_s21, %s171_s21  ;;  %p712_p11 = scmp.lt.s32.totalorder %s703_s26, %s703_s26 }
   0x9   : > { %p815_p5 = pnand %p658_p3, %p651_p4 }
   0xa   : > { %p713_p12 = por %p712_p11, %p711_p10 }
   0xb   : > { %p694_p6 = pneg %p815_p5 }
   0xd   : > { %p706_p8 = pnand %p704_p7, %p694_p6 }
   0xf   : > { %p707_p9 = pneg %p706_p8 }
  0x11   : > { %p714_p13 = pnand %p713_p12, %p707_p9 }
  0x13   : > { %717 = shalt.err (!%p714_p13)
}
  0x14   : > { %s762_s27 = smov 64   ;;  %s763_s28 = smov 4  }
  0x15   : > { %654 = dma.hbm_to_vmem [thread:$0]  (!%p815_p5), %s872_s1, 1024, %s171_s21, [#allocation3], %s762_s27, %s762_s27, %s763_s28  }
  0x16   : > { %s729_s6 = scalar_lea.vmem %s187_s24, 1024  ;;  %p737_p7 = scmp.lt.s32.totalorder %s187_s24, %s187_s24 }
  0x17   : > { %p730_p0 = scmp.ne.s32.totalorder %s187_s24, %s729_s6  ;;  %p738_p8 = scmp.lt.s32.totalorder %s729_s6, %s729_s6 }
  0x19   : > { %p732_p1 = pnand %p730_p0, %p694_p6  ;;  %p739_p10 = por %p738_p8, %p737_p7 }
  0x1b   : > { %p733_p4 = pneg %p732_p1 }
  0x1d   : > { %p740_p9 = pnand %p739_p10, %p733_p4 }
  0x1f   : > { %743 = shalt.err (!%p740_p9)
}
  0x20   : > { %657 = dma.hbm_to_vmem [thread:$0]  (!%p815_p5), %s874_s3, 1024, %s187_s24, [#allocation5], %s762_s27, %s762_s27, %s763_s28  }
  0x21   : > { %212 = sbr.rel (%p806_p2) target bundleno = 473 (0x1d9), region = 40 }
  0x26   : > { %749 = dma.done.wait (%p658_p3), [#allocation3], 1024  }
  0x27   : > { %751 = vsyncadd (%p658_p3), [#allocation3], 4294966272 }
  0x28   : > { %753 = dma.done.wait (%p658_p3), [#allocation5], 1024  }
  0x29   : > { %755 = vsyncadd (%p658_p3), [#allocation5], 4294966272  ;;  %v764_v0 = vmov 0.0   ;;  %vm765_vm0 = vmmov 0   ;;  %v676_v1 = vld [vmem:[#allocation2 + $0x38] sm:$0xff]   ;;  %v677_v2 = vld [vmem:[#allocation2 + $0x30] sm:$0xff]  }
  0x2a   : > { %603 = vmatprep.subr.bf16.mxu0 %v764_v0  ;;  %619 = vmatprep.mubr.msk.bf16.mxu0 %vm765_vm0, %v764_v0  ;;  %v678_v3 = vld [vmem:[#allocation2 + $0x28] sm:$0xff]   ;;  %v684_v4 = vld [vmem:[#allocation4 + $0x38] sm:$0xff]   ;;  %v679_v5 = vld [vmem:[#allocation2 + $0x20] sm:$0xff]   ;;  %p242_p2 = scmp.lt.s32.totalorder %s802_s19, 1 }
  0x2b   : > { %623 = vmatprep.subr.bf16.mxu1 %v764_v0  ;;  %639 = vmatprep.mubr.msk.bf16.mxu1 %vm765_vm0, %v764_v0  ;;  %v685_v6 = vld [vmem:[#allocation4 + $0x30] sm:$0xff]   ;;  %v680_v7 = vld [vmem:[#allocation2 + $0x18] sm:$0xff]   ;;  %v686_v8 = vld [vmem:[#allocation4 + $0x28] sm:$0xff]  }
  0x2c   : > { %604 = vmatpush3.bf16.msra.mxu0 %v676_v1  ;;  %624 = vmatpush3.bf16.msra.mxu1 %v684_v4  ;;  %s880_s19 = smov (!%p242_p2, %s802_s19), 1  ;;  %v681_v9 = vld [vmem:[#allocation2 + $0x10] sm:$0xff]   ;;  %v687_v10 = vld [vmem:[#allocation4 + $0x20] sm:$0xff]   ;;  %v682_v11 = vld [vmem:[#allocation2 + $0x8] sm:$0xff]  }
  0x2d   : > { %605 = vmatprep.subr.bf16.mxu0 %v764_v0  ;;  %625 = vmatprep.subr.bf16.mxu1 %v764_v0  ;;  %s563_s9 = sshll.u32 %s880_s19, 3  ;;  %v688_v12 = vld [vmem:[#allocation4 + $0x18] sm:$0xff]   ;;  %v683_v13 = vld [vmem:[#allocation2] sm:$0xff]   ;;  %v689_v15 = vld [vmem:[#allocation4 + $0x10] sm:$0xff]  }
  0x2e   : > { %s245_s12 = scalar_lea.vmem %s871_s0, %s563_s9  ;;  %v690_v17 = vld [vmem:[#allocation4 + $0x8] sm:$0xff]   ;;  %v691_v18 = vld [vmem:[#allocation4] sm:$0xff]   ;;  %s249_s21 = scalar_lea.vmem %s876_s5, %s563_s9 }
  0x2f   : > { %v251_v14 = vld [vmem:[%s245_s12] sm:$0xff] }
  0x30   : > { %606 = vmatpush3.bf16.msra.mxu0 %v677_v2  ;;  %626 = vmatpush3.bf16.msra.mxu1 %v685_v6  ;;  %v252_v16 = vpack.c.bf16 %v251_v14, %v251_v14  ;;  %v565_v19 = vld [vmem:[%s873_s2] ss:$0 sm:$0xff] }
  0x31   : > { %607 = vmatprep.subr.bf16.mxu0 %v764_v0  ;;  %627 = vmatprep.subr.bf16.mxu1 %v764_v0  ;;  %v574_v27 = vld [vmem:[%s875_s4] ss:$0 sm:$0xff] }
  0x34   : > { %608 = vmatpush3.bf16.msra.mxu0 %v678_v3  ;;  %628 = vmatpush3.bf16.msra.mxu1 %v686_v8 }
  0x35   : > { %609 = vmatprep.subr.bf16.mxu0 %v764_v0  ;;  %629 = vmatprep.subr.bf16.mxu1 %v764_v0 }
  0x38   : > { %610 = vmatpush3.bf16.msra.mxu0 %v679_v5  ;;  %630 = vmatpush3.bf16.msra.mxu1 %v687_v10 }
  0x39   : > { %611 = vmatprep.subr.bf16.mxu0 %v764_v0  ;;  %631 = vmatprep.subr.bf16.mxu1 %v764_v0 }
  0x3c   : > { %612 = vmatpush3.bf16.msra.mxu0 %v680_v7  ;;  %632 = vmatpush3.bf16.msra.mxu1 %v688_v12 }
  0x3d   : > { %613 = vmatprep.subr.bf16.mxu0 %v764_v0  ;;  %633 = vmatprep.subr.bf16.mxu1 %v764_v0 }
  0x40   : > { %614 = vmatpush3.bf16.msra.mxu0 %v681_v9  ;;  %634 = vmatpush3.bf16.msra.mxu1 %v689_v15 }
  0x41   : > { %615 = vmatprep.subr.bf16.mxu0 %v764_v0  ;;  %635 = vmatprep.subr.bf16.mxu1 %v764_v0 }
  0x44   : > { %616 = vmatpush3.bf16.msra.mxu0 %v682_v11  ;;  %636 = vmatpush3.bf16.msra.mxu1 %v690_v17 }
  0x45   : > { %617 = vmatprep.subr.bf16.mxu0 %v764_v0  ;;  %637 = vmatprep.subr.bf16.mxu1 %v764_v0 }
  0x48   : > { %618 = vmatpush3.bf16.msra.mxu0 %v683_v13  ;;  %638 = vmatpush3.bf16.msra.mxu1 %v691_v18 }
  0x4b   : > { %620 = vmatmul.mubr.bf16.vlgmr.msra.gmra.mxu0 %v252_v16 }
 0x10b   : > { %v358_v20 = vpop.f32.mrf.mxu0 }
 0x10c   : > { %v359_v21 = vadd.f32 %v565_v19, %v358_v20 }
 0x10d   : > { %v621_v22 = vpop.f32.mrf.mxu0 }
 0x10e   : > { %v364_v23 = vmax.f32 %v359_v21, 0.0 }
 0x10f   : > { %v361_v24 = vpop.f32.mrf.mxu0 }
 0x110   : > { %v365_v25 = vpack.c.bf16 %v364_v23, %v364_v23 }
 0x111   : > { %v622_v26 = vpop.f32.mrf.mxu0 }
 0x112   : > { %640 = vmatmul.mubr.bf16.vlgmr.msra.gmra.mxu1 %v365_v25 }
 0x1d2   : > { %v471_v28 = vpop.f32.mrf.mxu1 }
 0x1d3   : > { %v472_v29 = vadd.f32 %v574_v27, %v471_v28 }
 0x1d4   : > { %v641_v30 = vpop.f32.mrf.mxu1 }
 0x1d5   : > { %v477_v31 = vmax.f32 %v472_v29, 0.0 }
 0x1d6   : > { %v474_v32 = vpop.f32.mrf.mxu1 }
 0x1d7   : > { %478 = vst [vmem:[%s249_s21] sm:$0xff] %v477_v31 }
 0x1d8   : > { %v642_v33 = vpop.f32.mrf.mxu1 }
 0x1d9 PF: > { %s17_s18 = sadd.s32 1, %s758_s18  }
 0x1da   : > { %p14_p3 = scmp.ge.s32.totalorder %s17_s18, 4  }
 0x1dc   :  { %16 = sbr.rel (!%p14_p3) target bundleno = 2 (0x2), region = 79 }
 0x1e1   :  { %498 = vsyncpa [#allocation3], 1 }
 0x1e2   :  { %500 = vsyncpa [#allocation3 + $0x1], 1 }
 0x1e3   :  { %501 = vsyncpa [#allocation5], 1 }

// kernel: _forward_impl.1
= control target key start
LH: loop header
LB: loop body
LE: loop exit
PB: predicated region body
PF: predicated region fallthrough
CT: control target
= control target key end

     0   :  { %10 = vsyncpa [#allocation3], 0  ;;  %s871_s0 = inlined_call_operand.vmem [shape: f32[16,128], index: 0, kind: input, shape index: {}]   ;;  %s872_s1 = inlined_call_operand.hbm [shape: bf16[128,128], index: 1, kind: input, shape index: {}]   ;;  %s873_s2 = inlined_call_operand.vmem [shape: f32[1,128], index: 2, kind: input, shape index: {}]   ;;  %s874_s3 = inlined_call_operand.hbm [shape: bf16[128,128], index: 3, kind: input, shape index: {}]   ;;  %s875_s4 = inlined_call_operand.vmem [shape: f32[1,128], index: 4, kind: input, shape index: {}]   ;;  %s876_s5 = inlined_call_operand.vmem [shape: f32[16,128], index: 5, kind: output, shape index: {}]  }
   0x1   :  { %11 = vsyncpa [#allocation5], 0  ;;  %s796_s18 = smov 0  }
   0x2 LB: > { %s802_s19 = sadd.s32 4294967295, %s758_s18   ;;  %p556_p0 = scmp.ge.s32.totalorder %s758_s18, 1  ;;  %s758_s18 = sphi %s796_s18, %s17_s18  }
   0x3   : > { %p158_p1 = scmp.lt.s32.totalorder %s758_s18, 3  ;;  %s760_s20 = smov [#allocation2]  }
   0x4   : > { %s170_s21 = sshll.u32 %s760_s20, 4  ;;  %p658_p3 = scmp.eq.s32.totalorder %s802_s19, 0  ;;  %s171_s21 = int_to_ptr.vmem [resolvable:$true] %s170_s21 }
   0x5   : > { %p806_p2 = pnand %p556_p0, %p158_p1  ;;  %s761_s23 = smov [#allocation4]  }
   0x6   : > { %s186_s24 = sshll.u32 %s761_s23, 4  ;;  %s703_s26 = scalar_lea.vmem %s171_s21, 1024  ;;  %s187_s24 = int_to_ptr.vmem [resolvable:$true] %s186_s24 }
   0x7   : > { %p651_p4 = pneg %p806_p2  ;;  %p704_p7 = scmp.ne.s32.totalorder %s171_s21, %s703_s26 }
   0x8   : > { %p711_p10 = scmp.lt.s32.totalorder %s171_s21, %s171_s21  ;;  %p712_p11 = scmp.lt.s32.totalorder %s703_s26, %s703_s26 }
   0x9   : > { %p815_p5 = pnand %p658_p3, %p651_p4 }
   0xa   : > { %p713_p12 = por %p712_p11, %p711_p10 }
   0xb   : > { %p694_p6 = pneg %p815_p5 }
   0xd   : > { %p706_p8 = pnand %p704_p7, %p694_p6 }
   0xf   : > { %p707_p9 = pneg %p706_p8 }
  0x11   : > { %p714_p13 = pnand %p713_p12, %p707_p9 }
  0x13   : > { %717 = shalt.err (!%p714_p13)
}
  0x14   : > { %s762_s27 = smov 64   ;;  %s763_s28 = smov 4  }
  0x15   : > { %654 = dma.hbm_to_vmem [thread:$0]  (!%p815_p5), %s872_s1, 1024, %s171_s21, [#allocation3], %s762_s27, %s762_s27, %s763_s28  }
  0x16   : > { %s729_s6 = scalar_lea.vmem %s187_s24, 1024  ;;  %p737_p7 = scmp.lt.s32.totalorder %s187_s24, %s187_s24 }
  0x17   : > { %p730_p0 = scmp.ne.s32.totalorder %s187_s24, %s729_s6  ;;  %p738_p8 = scmp.lt.s32.totalorder %s729_s6, %s729_s6 }
  0x19   : > { %p732_p1 = pnand %p730_p0, %p694_p6  ;;  %p739_p10 = por %p738_p8, %p737_p7 }
  0x1b   : > { %p733_p4 = pneg %p732_p1 }
  0x1d   : > { %p740_p9 = pnand %p739_p10, %p733_p4 }
  0x1f   : > { %743 = shalt.err (!%p740_p9)
}
  0x20   : > { %657 = dma.hbm_to_vmem [thread:$0]  (!%p815_p5), %s874_s3, 1024, %s187_s24, [#allocation5], %s762_s27, %s762_s27, %s763_s28  }
  0x21   : > { %212 = sbr.rel (%p806_p2) target bundleno = 473 (0x1d9), region = 40 }
  0x26   : > { %749 = dma.done.wait (%p658_p3), [#allocation3], 1024  }
  0x27   : > { %751 = vsyncadd (%p658_p3), [#allocation3], 4294966272 }
  0x28   : > { %753 = dma.done.wait (%p658_p3), [#allocation5], 1024  }
  0x29   : > { %755 = vsyncadd (%p658_p3), [#allocation5], 4294966272  ;;  %v764_v0 = vmov 0.0   ;;  %vm765_vm0 = vmmov 0   ;;  %v676_v1 = vld [vmem:[#allocation2 + $0x38] sm:$0xff]   ;;  %v677_v2 = vld [vmem:[#allocation2 + $0x30] sm:$0xff]  }
  0x2a   : > { %603 = vmatprep.subr.bf16.mxu0 %v764_v0  ;;  %619 = vmatprep.mubr.msk.bf16.mxu0 %vm765_vm0, %v764_v0  ;;  %v678_v3 = vld [vmem:[#allocation2 + $0x28] sm:$0xff]   ;;  %v684_v4 = vld [vmem:[#allocation4 + $0x38] sm:$0xff]   ;;  %v679_v5 = vld [vmem:[#allocation2 + $0x20] sm:$0xff]   ;;  %p242_p2 = scmp.lt.s32.totalorder %s802_s19, 1 }
  0x2b   : > { %623 = vmatprep.subr.bf16.mxu1 %v764_v0  ;;  %639 = vmatprep.mubr.msk.bf16.mxu1 %vm765_vm0, %v764_v0  ;;  %v685_v6 = vld [vmem:[#allocation4 + $0x30] sm:$0xff]   ;;  %v680_v7 = vld [vmem:[#allocation2 + $0x18] sm:$0xff]   ;;  %v686_v8 = vld [vmem:[#allocation4 + $0x28] sm:$0xff]  }
  0x2c   : > { %604 = vmatpush3.bf16.msra.mxu0 %v676_v1  ;;  %624 = vmatpush3.bf16.msra.mxu1 %v684_v4  ;;  %s880_s19 = smov (!%p242_p2, %s802_s19), 1  ;;  %v681_v9 = vld [vmem:[#allocation2 + $0x10] sm:$0xff]   ;;  %v687_v10 = vld [vmem:[#allocation4 + $0x20] sm:$0xff]   ;;  %v682_v11 = vld [vmem:[#allocation2 + $0x8] sm:$0xff]  }
  0x2d   : > { %605 = vmatprep.subr.bf16.mxu0 %v764_v0  ;;  %625 = vmatprep.subr.bf16.mxu1 %v764_v0  ;;  %s563_s9 = sshll.u32 %s880_s19, 3  ;;  %v688_v12 = vld [vmem:[#allocation4 + $0x18] sm:$0xff]   ;;  %v683_v13 = vld [vmem:[#allocation2] sm:$0xff]   ;;  %v689_v15 = vld [vmem:[#allocation4 + $0x10] sm:$0xff]  }
  0x2e   : > { %s245_s12 = scalar_lea.vmem %s871_s0, %s563_s9  ;;  %v690_v17 = vld [vmem:[#allocation4 + $0x8] sm:$0xff]   ;;  %v691_v18 = vld [vmem:[#allocation4] sm:$0xff]   ;;  %s249_s21 = scalar_lea.vmem %s876_s5, %s563_s9 }
  0x2f   : > { %v251_v14 = vld [vmem:[%s245_s12] sm:$0xff] }
  0x30   : > { %606 = vmatpush3.bf16.msra.mxu0 %v677_v2  ;;  %626 = vmatpush3.bf16.msra.mxu1 %v685_v6  ;;  %v252_v16 = vpack.c.bf16 %v251_v14, %v251_v14  ;;  %v565_v19 = vld [vmem:[%s873_s2] ss:$0 sm:$0xff] }
  0x31   : > { %607 = vmatprep.subr.bf16.mxu0 %v764_v0  ;;  %627 = vmatprep.subr.bf16.mxu1 %v764_v0  ;;  %v574_v27 = vld [vmem:[%s875_s4] ss:$0 sm:$0xff] }
  0x34   : > { %608 = vmatpush3.bf16.msra.mxu0 %v678_v3  ;;  %628 = vmatpush3.bf16.msra.mxu1 %v686_v8 }
  0x35   : > { %609 = vmatprep.subr.bf16.mxu0 %v764_v0  ;;  %629 = vmatprep.subr.bf16.mxu1 %v764_v0 }
  0x38   : > { %610 = vmatpush3.bf16.msra.mxu0 %v679_v5  ;;  %630 = vmatpush3.bf16.msra.mxu1 %v687_v10 }
  0x39   : > { %611 = vmatprep.subr.bf16.mxu0 %v764_v0  ;;  %631 = vmatprep.subr.bf16.mxu1 %v764_v0 }
  0x3c   : > { %612 = vmatpush3.bf16.msra.mxu0 %v680_v7  ;;  %632 = vmatpush3.bf16.msra.mxu1 %v688_v12 }
  0x3d   : > { %613 = vmatprep.subr.bf16.mxu0 %v764_v0  ;;  %633 = vmatprep.subr.bf16.mxu1 %v764_v0 }
  0x40   : > { %614 = vmatpush3.bf16.msra.mxu0 %v681_v9  ;;  %634 = vmatpush3.bf16.msra.mxu1 %v689_v15 }
  0x41   : > { %615 = vmatprep.subr.bf16.mxu0 %v764_v0  ;;  %635 = vmatprep.subr.bf16.mxu1 %v764_v0 }
  0x44   : > { %616 = vmatpush3.bf16.msra.mxu0 %v682_v11  ;;  %636 = vmatpush3.bf16.msra.mxu1 %v690_v17 }
  0x45   : > { %617 = vmatprep.subr.bf16.mxu0 %v764_v0  ;;  %637 = vmatprep.subr.bf16.mxu1 %v764_v0 }
  0x48   : > { %618 = vmatpush3.bf16.msra.mxu0 %v683_v13  ;;  %638 = vmatpush3.bf16.msra.mxu1 %v691_v18 }
  0x4b   : > { %620 = vmatmul.mubr.bf16.vlgmr.msra.gmra.mxu0 %v252_v16 }
 0x10b   : > { %v358_v20 = vpop.f32.mrf.mxu0 }
 0x10c   : > { %v359_v21 = vadd.f32 %v565_v19, %v358_v20 }
 0x10d   : > { %v621_v22 = vpop.f32.mrf.mxu0 }
 0x10e   : > { %v364_v23 = vmax.f32 %v359_v21, 0.0 }
 0x10f   : > { %v361_v24 = vpop.f32.mrf.mxu0 }
 0x110   : > { %v365_v25 = vpack.c.bf16 %v364_v23, %v364_v23 }
 0x111   : > { %v622_v26 = vpop.f32.mrf.mxu0 }
 0x112   : > { %640 = vmatmul.mubr.bf16.vlgmr.msra.gmra.mxu1 %v365_v25 }
 0x1d2   : > { %v471_v28 = vpop.f32.mrf.mxu1 }
 0x1d3   : > { %v472_v29 = vadd.f32 %v574_v27, %v471_v28 }
 0x1d4   : > { %v641_v30 = vpop.f32.mrf.mxu1 }
 0x1d5   : > { %v477_v31 = vmax.f32 %v472_v29, 0.0 }
 0x1d6   : > { %v474_v32 = vpop.f32.mrf.mxu1 }
 0x1d7   : > { %478 = vst [vmem:[%s249_s21] sm:$0xff] %v477_v31 }
 0x1d8   : > { %v642_v33 = vpop.f32.mrf.mxu1 }
 0x1d9 PF: > { %s17_s18 = sadd.s32 1, %s758_s18  }
 0x1da   : > { %p14_p3 = scmp.ge.s32.totalorder %s17_s18, 4  }
 0x1dc   :  { %16 = sbr.rel (!%p14_p3) target bundleno = 2 (0x2), region = 79 }
 0x1e1   :  { %498 = vsyncpa [#allocation3], 1 }
 0x1e2   :  { %500 = vsyncpa [#allocation3 + $0x1], 1 }
 0x1e3   :  { %501 = vsyncpa [#allocation5], 1 }

</bundles_post_ra>
